<compile_context>
chip_gen: v5e
topology: v5e:2x2
jax: 0.10.0
libtpu: 0.0.40
codegen_flags: <defaults>
</compile_context>

<pallas_src>
import math
from functools import partial

import jax
import jax.numpy as jnp
from jax.experimental import pallas as pl
from jax.experimental.pallas import tpu as pltpu


def _self_attention_kernel(q_ref, k_ref, v_ref, keep_ref,
                           wq_ref, bq_ref, wk_ref, bk_ref,
                           wv_ref, bv_ref, wfc_ref, bfc_ref,
                           out_ref, *, block_b, tq, seq_len, hid_p,
                           approx_recip):
    mq = block_b * tq
    mk = block_b * seq_len

    # Cast to bf16 after load (inputs are f32 when H is lane-aligned, padded
    # bf16 otherwise); fold the batch tile into the matmul M dimension.
    q2 = q_ref[...].astype(jnp.bfloat16).reshape(mq, hid_p)
    k2 = k_ref[...].astype(jnp.bfloat16).reshape(mk, hid_p)
    v2 = v_ref[...].astype(jnp.bfloat16).reshape(mk, hid_p)

    # Linear projections y = x @ W + b (bf16 MXU operands, f32 accumulation).
    # The 1/sqrt(hid_dim) attention scale is pre-folded into wq/bq.
    Q = jnp.dot(q2, wq_ref[...], preferred_element_type=jnp.float32) + bq_ref[...]
    K = jnp.dot(k2, wk_ref[...], preferred_element_type=jnp.float32) + bk_ref[...]
    V = jnp.dot(v2, wv_ref[...], preferred_element_type=jnp.float32) + bv_ref[...]

    Qb = Q.astype(jnp.bfloat16).reshape(block_b, tq, hid_p)
    Kb = K.astype(jnp.bfloat16).reshape(block_b, seq_len, hid_p)
    Vb = V.astype(jnp.bfloat16).reshape(block_b, seq_len, hid_p)

    # energy = (Q/sqrt(H)) @ K^T : contract the last axes directly so no
    # transposed copy of K is materialized (MXU consumes it natively).
    energy = jnp.einsum("bqd,bkd->bqk", Qb, Kb,
                        preferred_element_type=jnp.float32)

    # masked_fill parity (the PyTorch module masks entire query rows):
    # keep==1 -> energy, keep==0 -> exactly -1e10.  Only the keep stream is
    # DMA'd; the fill term is derived in-kernel.
    keep = keep_ref[...]                                   # f32 [block_b, tq, 1]
    energy = energy * keep + (1.0 - keep) * jnp.float32(-1e10)

    # Softmax over keys, all in f32.
    e_max = jnp.max(energy, axis=-1, keepdims=True)
    e_exp = jnp.exp(energy - e_max)
    denom = jnp.sum(e_exp, axis=-1, keepdims=True)
    if approx_recip:
        attn = e_exp * pl.reciprocal(denom, approx=True)   # EUP slot, ~free
    else:
        attn = e_exp / denom
    # (dropout == identity in eval mode)

    # x = attention @ V ; out = x @ W_fc + b_fc
    x = jnp.einsum("bqk,bkd->bqd", attn.astype(jnp.bfloat16), Vb,
                   preferred_element_type=jnp.float32)
    x2 = x.reshape(mq, hid_p).astype(jnp.bfloat16)
    out = jnp.dot(x2, wfc_ref[...], preferred_element_type=jnp.float32) + bfc_ref[...]

    out_ref[...] = out.reshape(block_b, tq, hid_p).astype(out_ref.dtype)


def _round_up(x, m):
    return ((x + m - 1) // m) * m


def _tpu_generation():
    """Returns (vmem_capacity_bytes, has_two_tensorcores).

    v7x: 64 MiB VMEM per TensorCore, 2 TCs/chip.  v5e/v6e: 128 MiB, 1 TC."""
    vmem = 128 * 1024 * 1024
    try:
        info = pltpu.get_tpu_info()
        vmem = int(getattr(info, "vmem_capacity_bytes", vmem))
    except Exception:
        pass
    return vmem, vmem <= 64 * 1024 * 1024


def _pick_block_b(batch, seq, mm_target=256):
    """Batch elements per grid step so block_b*seq fills the 256-wide MXU M dim
    (v6e/v7x); v5e's 128x128 MXU is trivially saturated as well."""
    bt = min(batch, max(1, -(-mm_target // max(seq, 1))))
    while batch % bt:
        bt -= 1
    return bt


def _pick_tq(seq, block_b, score_budget_bytes=8 * 1024 * 1024):
    """Query-tile size: keep in-flight f32 score tiles (energy + exp, about
    2*block_b*tq*seq*4 B) under budget so VMEM use is bounded for large seq."""
    cap = score_budget_bytes // max(1, 2 * block_b * seq * 4)
    if cap >= seq:
        return seq
    tq = max(8, (cap // 8) * 8)
    while tq >= 8 and seq % tq:
        tq -= 8
    return tq if (tq >= 8 and seq % tq == 0) else seq


def init_params(key, hid_dim):
    """Deterministic init matching nn.Linear(hid_dim, hid_dim) shapes.
    Weights stored pre-transposed: [H_in, H_out]."""
    ks = jax.random.split(key, 8)
    lim = 1.0 / math.sqrt(hid_dim)

    def w(k):
        return jax.random.uniform(k, (hid_dim, hid_dim), jnp.float32, -lim, lim)

    def b(k):
        return jax.random.uniform(k, (hid_dim,), jnp.float32, -lim, lim)

    return {
        "wq": w(ks[0]), "bq": b(ks[1]),
        "wk": w(ks[2]), "bk": b(ks[3]),
        "wv": w(ks[4]), "bv": b(ks[5]),
        "wfc": w(ks[6]), "bfc": b(ks[7]),
    }


def prepare_params(params, hid_dim):
    """One-time parameter prep (hoisted out of the per-call path):
    zero-pad to the lane-dense hidden dim, cast weights to bf16, and fold the
    1/sqrt(hid_dim) attention scale into wq/bq.  Cache the result."""
    Hp = _round_up(hid_dim, 128)
    pad = Hp - hid_dim
    scale = 1.0 / math.sqrt(float(hid_dim))

    def w(x, s=1.0):
        x = jnp.asarray(x, jnp.float32) * s
        if pad:
            x = jnp.pad(x, ((0, pad), (0, pad)))
        return x.astype(jnp.bfloat16)

    def b(x, s=1.0):
        x = jnp.asarray(x, jnp.float32) * s
        if pad:
            x = jnp.pad(x, ((0, pad),))
        return x.reshape(1, Hp)                      # biases stay f32

    return {
        "wq": w(params["wq"], scale), "bq": b(params["bq"], scale),
        "wk": w(params["wk"]), "bk": b(params["bk"]),
        "wv": w(params["wv"]), "bv": b(params["bv"]),
        "wfc": w(params["wfc"]), "bfc": b(params["bfc"]),
    }


def self_attention(query, key, value, mask, prepared,
                   out_dtype=jnp.bfloat16, approx_reciprocal=True):
    """query/key/value: [B, S, H]; mask: [B, S] (1 keep / 0 masked);
    prepared: output of prepare_params()."""
    B, S, H = query.shape
    Hp = prepared["wq"].shape[0]
    pad = Hp - H

    # Activations: read f32 directly when H is lane-aligned; otherwise fuse the
    # zero-pad with the bf16 cast in a single wrapper pass.
    if pad:
        def act(x):
            return jnp.pad(x.astype(jnp.bfloat16), ((0, 0), (0, 0), (0, pad)))
    else:
        def act(x):
            return x
    qp, kp, vp = act(query), act(key), act(value)
    keep3 = mask.astype(jnp.float32).reshape(B, S, 1)

    vmem_cap, two_cores = _tpu_generation()
    block_b = _pick_block_b(B, S)
    tq = _pick_tq(S, block_b)
    # v7x has 2 TensorCores: ensure the "parallel" grid has >= 2 steps.
    # (v5e/v6e are single-TC; keep the big tile there.)
    while two_cores and (B // block_b) * (S // tq) < 2 and block_b > 1:
        block_b -= 1
        while B % block_b:
            block_b -= 1

    n_b, n_q = B // block_b, S // tq
    in_sz = qp.dtype.itemsize
    out_sz = jnp.dtype(out_dtype).itemsize

    # VMEM budget from the actual block sizes, capped per-generation.
    weights_bytes = 4 * Hp * Hp * 2 + 4 * Hp * 4                    # single copies
    stream_bytes = 2 * (block_b * (tq + 2 * S) * Hp * in_sz         # q,k,v dbl-buf
                        + block_b * tq * 4                          # mask
                        + block_b * tq * Hp * out_sz)               # output
    live_f32 = (2 * block_b * tq * S
                + (2 * tq + 3 * S) * block_b * Hp) * 4              # scores + QKVx
    est = weights_bytes + stream_bytes + live_f32
    vmem_limit = min(int(vmem_cap * 0.8), max(32 * 1024 * 1024, 2 * est))

    q_spec = pl.BlockSpec((block_b, tq, Hp), lambda b, q: (b, q, 0))
    kv_spec = pl.BlockSpec((block_b, S, Hp), lambda b, q: (b, 0, 0))
    msk_spec = pl.BlockSpec((block_b, tq, 1), lambda b, q: (b, q, 0))
    out_spec = pl.BlockSpec((block_b, tq, Hp), lambda b, q: (b, q, 0))
    # Weights/biases never change across the grid: single VMEM-resident copy.
    const_spec = pl.BlockSpec(memory_space=pltpu.MemorySpace.VMEM)

    kernel = partial(_self_attention_kernel,
                     block_b=block_b, tq=tq, seq_len=S, hid_p=Hp,
                     approx_recip=approx_reciprocal)

    flops = (2 * B * S * Hp * Hp * 2            # Q + fc projections
             + 2 * B * S * Hp * Hp * 2 * n_q    # K, V projections (per q-tile)
             + 4 * B * S * S * Hp)              # QK^T and attn@V
    bytes_accessed = (3 * B * S * Hp * in_sz + B * S * Hp * out_sz
                      + B * S * 4 + 4 * Hp * Hp * 2 + 4 * Hp * 4)

    out_padded = pl.pallas_call(
        kernel,
        out_shape=jax.ShapeDtypeStruct((B, S, Hp), out_dtype),
        grid_spec=pltpu.PrefetchScalarGridSpec(
            num_scalar_prefetch=0,
            grid=(n_b, n_q),
            in_specs=[q_spec, kv_spec, kv_spec, msk_spec,
                      const_spec, const_spec, const_spec, const_spec,
                      const_spec, const_spec, const_spec, const_spec],
            out_specs=out_spec,
        ),
        compiler_params=pltpu.CompilerParams(
            dimension_semantics=("parallel", "parallel"),
            vmem_limit_bytes=int(vmem_limit)),
        cost_estimate=pl.CostEstimate(
            flops=int(flops),
            transcendentals=int(B * S * S),
            bytes_accessed=int(bytes_accessed)),
    )(qp, kp, vp, keep3,
      prepared["wq"], prepared["bq"], prepared["wk"], prepared["bk"],
      prepared["wv"], prepared["bv"], prepared["wfc"], prepared["bfc"])

    return out_padded[..., :H]


def _reference(query, key, value, mask, params):
    """Pure-JAX reference mirroring the PyTorch forward (eval mode) with the
    same bf16-matmul / f32-softmax numerics as the kernel."""
    f32, bf16 = jnp.float32, jnp.bfloat16
    H = query.shape[-1]

    def linear(x, w, b):
        return jnp.dot(x.astype(bf16), w.astype(bf16),
                       preferred_element_type=f32) + b

    Q = linear(query, params["wq"], params["bq"])
    K = linear(key, params["wk"], params["bk"])
    V = linear(value, params["wv"], params["bv"])
    energy = jnp.einsum("bqh,bkh->bqk", Q.astype(bf16), K.astype(bf16),
                        preferred_element_type=f32) / jnp.sqrt(f32(H))
    expanded = mask[..., None].astype(f32)      # [B,S,1] broadcast over keys
    energy = jnp.where(expanded == 0.0, f32(-1e10), energy)
    attn = jax.nn.softmax(energy, axis=-1)
    x = jnp.einsum("bqk,bkh->bqh", attn.astype(bf16), V.astype(bf16),
                   preferred_element_type=f32)
    return jnp.dot(x.astype(bf16), params["wfc"].astype(bf16),
                   preferred_element_type=f32) + params["bfc"]


if __name__ == "__main__":
    B, S, H = 2, 8, 32
    root = jax.random.PRNGKey(0)
    k_q, k_k, k_v, k_p = jax.random.split(root, 4)

    query = jax.random.normal(k_q, (B, S, H), jnp.float32)
    key_in = jax.random.normal(k_k, (B, S, H), jnp.float32)
    value = jax.random.normal(k_v, (B, S, H), jnp.float32)
    # Deterministic padding mask: first batch keeps 6 positions, second keeps 4.
    lengths = jnp.array([6, 4], dtype=jnp.int32)
    mask = (jnp.arange(S)[None, :] < lengths[:, None]).astype(jnp.float32)

    params = init_params(k_p, H)
    prepared = prepare_params(params, H)     # one-time pad/cast/scale-fold

    attn_fn = jax.jit(self_attention)
    out = jax.block_until_ready(attn_fn(query, key_in, value, mask, prepared))

    ref = _reference(query, key_in, value, mask, params)
    assert out.shape == (B, S, H)
    max_err = float(jnp.max(jnp.abs(out.astype(jnp.float32) - ref)))
    assert max_err < 2e-2, max_err

    print("KERNEL_OK")
</pallas_src>

<mosaic_0001>
module attributes {stable_mosaic.version = 11 : i64} {
  func.func @_self_attention_kernel(%arg0: i32, %arg1: i32, %arg2: memref<2x8x128xbf16, #tpu.memory_space<vmem>>, %arg3: memref<2x8x128xbf16, #tpu.memory_space<vmem>>, %arg4: memref<2x8x128xbf16, #tpu.memory_space<vmem>>, %arg5: memref<2x8x1xf32, #tpu.memory_space<vmem>>, %arg6: memref<128x128xbf16, #tpu.memory_space<vmem>>, %arg7: memref<1x128xf32, #tpu.memory_space<vmem>>, %arg8: memref<128x128xbf16, #tpu.memory_space<vmem>>, %arg9: memref<1x128xf32, #tpu.memory_space<vmem>>, %arg10: memref<128x128xbf16, #tpu.memory_space<vmem>>, %arg11: memref<1x128xf32, #tpu.memory_space<vmem>>, %arg12: memref<128x128xbf16, #tpu.memory_space<vmem>>, %arg13: memref<1x128xf32, #tpu.memory_space<vmem>>, %arg14: memref<2x8x128xbf16, #tpu.memory_space<vmem>>) attributes {dimension_semantics = [#tpu.dimension_semantics<parallel>, #tpu.dimension_semantics<parallel>], iteration_bounds = array<i64: 1, 1>, scalar_prefetch = 0 : i64, scratch_operands = 0 : i64, tpu.core_type = #tpu.core_type<tc>, window_params = [{transform_indices = @transform_0, window_bounds = array<i64: 2, 8, 128>}, {transform_indices = @transform_1, window_bounds = array<i64: 2, 8, 128>}, {transform_indices = @transform_2, window_bounds = array<i64: 2, 8, 128>}, {transform_indices = @transform_3, window_bounds = array<i64: 2, 8, 1>}, {pipeline_mode = #tpu.pipeline_mode<synchronous>, transform_indices = @transform_4, window_bounds = array<i64: 128, 128>}, {pipeline_mode = #tpu.pipeline_mode<synchronous>, transform_indices = @transform_5, window_bounds = array<i64: 1, 128>}, {pipeline_mode = #tpu.pipeline_mode<synchronous>, transform_indices = @transform_6, window_bounds = array<i64: 128, 128>}, {pipeline_mode = #tpu.pipeline_mode<synchronous>, transform_indices = @transform_7, window_bounds = array<i64: 1, 128>}, {pipeline_mode = #tpu.pipeline_mode<synchronous>, transform_indices = @transform_8, window_bounds = array<i64: 128, 128>}, {pipeline_mode = #tpu.pipeline_mode<synchronous>, transform_indices = @transform_9, window_bounds = array<i64: 1, 128>}, {pipeline_mode = #tpu.pipeline_mode<synchronous>, transform_indices = @transform_10, window_bounds = array<i64: 128, 128>}, {pipeline_mode = #tpu.pipeline_mode<synchronous>, transform_indices = @transform_11, window_bounds = array<i64: 1, 128>}, {transform_indices = @transform_12, window_bounds = array<i64: 2, 8, 128>}]} {
    %c0 = arith.constant 0 : index
    %c0_0 = arith.constant 0 : index
    %c0_1 = arith.constant 0 : index
    %0 = vector.load %arg2[%c0, %c0_0, %c0_1] : memref<2x8x128xbf16, #tpu.memory_space<vmem>>, vector<2x8x128xbf16>
    %1 = vector.shape_cast %0 : vector<2x8x128xbf16> to vector<16x128xbf16>
    %c0_2 = arith.constant 0 : index
    %c0_3 = arith.constant 0 : index
    %c0_4 = arith.constant 0 : index
    %2 = vector.load %arg3[%c0_2, %c0_3, %c0_4] : memref<2x8x128xbf16, #tpu.memory_space<vmem>>, vector<2x8x128xbf16>
    %3 = vector.shape_cast %2 : vector<2x8x128xbf16> to vector<16x128xbf16>
    %c0_5 = arith.constant 0 : index
    %c0_6 = arith.constant 0 : index
    %c0_7 = arith.constant 0 : index
    %4 = vector.load %arg4[%c0_5, %c0_6, %c0_7] : memref<2x8x128xbf16, #tpu.memory_space<vmem>>, vector<2x8x128xbf16>
    %5 = vector.shape_cast %4 : vector<2x8x128xbf16> to vector<16x128xbf16>
    %c0_8 = arith.constant 0 : index
    %c0_9 = arith.constant 0 : index
    %6 = vector.load %arg6[%c0_8, %c0_9] : memref<128x128xbf16, #tpu.memory_space<vmem>>, vector<128x128xbf16>
    %cst = arith.constant dense<0.000000e+00> : vector<16x128xf32>
    %7 = tpu.matmul %1, %6, %cst {dimension_numbers = #tpu.dot_dimension_numbers<[1], [0], [0], [1], [0, 0, 1, 1], [], []>} : vector<16x128xbf16>, vector<128x128xbf16>, vector<16x128xf32> -> vector<16x128xf32>
    %c0_10 = arith.constant 0 : index
    %c0_11 = arith.constant 0 : index
    %8 = vector.load %arg7[%c0_10, %c0_11] : memref<1x128xf32, #tpu.memory_space<vmem>>, vector<1x128xf32>
    %9 = vector.broadcast %8 : vector<1x128xf32> to vector<16x128xf32>
    %10 = arith.addf %7, %9 : vector<16x128xf32>
    %c0_12 = arith.constant 0 : index
    %c0_13 = arith.constant 0 : index
    %11 = vector.load %arg8[%c0_12, %c0_13] : memref<128x128xbf16, #tpu.memory_space<vmem>>, vector<128x128xbf16>
    %cst_14 = arith.constant dense<0.000000e+00> : vector<16x128xf32>
    %12 = tpu.matmul %3, %11, %cst_14 {dimension_numbers = #tpu.dot_dimension_numbers<[1], [0], [0], [1], [0, 0, 1, 1], [], []>} : vector<16x128xbf16>, vector<128x128xbf16>, vector<16x128xf32> -> vector<16x128xf32>
    %c0_15 = arith.constant 0 : index
    %c0_16 = arith.constant 0 : index
    %13 = vector.load %arg9[%c0_15, %c0_16] : memref<1x128xf32, #tpu.memory_space<vmem>>, vector<1x128xf32>
    %14 = vector.broadcast %13 : vector<1x128xf32> to vector<16x128xf32>
    %15 = arith.addf %12, %14 : vector<16x128xf32>
    %c0_17 = arith.constant 0 : index
    %c0_18 = arith.constant 0 : index
    %16 = vector.load %arg10[%c0_17, %c0_18] : memref<128x128xbf16, #tpu.memory_space<vmem>>, vector<128x128xbf16>
    %cst_19 = arith.constant dense<0.000000e+00> : vector<16x128xf32>
    %17 = tpu.matmul %5, %16, %cst_19 {dimension_numbers = #tpu.dot_dimension_numbers<[1], [0], [0], [1], [0, 0, 1, 1], [], []>} : vector<16x128xbf16>, vector<128x128xbf16>, vector<16x128xf32> -> vector<16x128xf32>
    %c0_20 = arith.constant 0 : index
    %c0_21 = arith.constant 0 : index
    %18 = vector.load %arg11[%c0_20, %c0_21] : memref<1x128xf32, #tpu.memory_space<vmem>>, vector<1x128xf32>
    %19 = vector.broadcast %18 : vector<1x128xf32> to vector<16x128xf32>
    %20 = arith.addf %17, %19 : vector<16x128xf32>
    %21 = arith.truncf %10 : vector<16x128xf32> to vector<16x128xbf16>
    %22 = vector.shape_cast %21 : vector<16x128xbf16> to vector<2x8x128xbf16>
    %23 = arith.truncf %15 : vector<16x128xf32> to vector<16x128xbf16>
    %24 = vector.shape_cast %23 : vector<16x128xbf16> to vector<2x8x128xbf16>
    %25 = arith.truncf %20 : vector<16x128xf32> to vector<16x128xbf16>
    %26 = vector.shape_cast %25 : vector<16x128xbf16> to vector<2x8x128xbf16>
    "tpu.trace_start"() <{level = 10 : i32, message = "bqd,bkd->bqk"}> : () -> ()
    %cst_22 = arith.constant dense<0.000000e+00> : vector<2x8x8xf32>
    %27 = tpu.matmul %22, %24, %cst_22 {dimension_numbers = #tpu.dot_dimension_numbers<[2], [2], [1], [1], [0, 0, 0, 1, 1, 1], [0], [0]>} : vector<2x8x128xbf16>, vector<2x8x128xbf16>, vector<2x8x8xf32> -> vector<2x8x8xf32>
    "tpu.trace_stop"() : () -> ()
    %c0_23 = arith.constant 0 : index
    %c0_24 = arith.constant 0 : index
    %c0_25 = arith.constant 0 : index
    %28 = vector.load %arg5[%c0_23, %c0_24, %c0_25] : memref<2x8x1xf32, #tpu.memory_space<vmem>>, vector<2x8x1xf32>
    %29 = vector.broadcast %28 : vector<2x8x1xf32> to vector<2x8x8xf32>
    %30 = arith.mulf %27, %29 : vector<2x8x8xf32>
    %cst_26 = arith.constant 1.000000e+00 : f32
    %31 = vector.broadcast %cst_26 : f32 to vector<2x8x1xf32>
    %32 = arith.subf %31, %28 : vector<2x8x1xf32>
    %cst_27 = arith.constant -1.000000e+10 : f32
    %33 = vector.broadcast %cst_27 : f32 to vector<2x8x1xf32>
    %34 = arith.mulf %32, %33 : vector<2x8x1xf32>
    %35 = vector.broadcast %34 : vector<2x8x1xf32> to vector<2x8x8xf32>
    %36 = arith.addf %30, %35 : vector<2x8x8xf32>
    %cst_28 = arith.constant dense<0xFF800000> : vector<2x8xf32>
    %37 = vector.multi_reduction <maximumf>, %36, %cst_28 [2] : vector<2x8x8xf32> to vector<2x8xf32>
    %38 = vector.shape_cast %37 : vector<2x8xf32> to vector<2x8x1xf32>
    %39 = vector.broadcast %38 : vector<2x8x1xf32> to vector<2x8x8xf32>
    %40 = arith.subf %36, %39 : vector<2x8x8xf32>
    %41 = math.exp %40 : vector<2x8x8xf32>
    %cst_29 = arith.constant dense<0.000000e+00> : vector<2x8xf32>
    %42 = vector.multi_reduction <add>, %41, %cst_29 [2] : vector<2x8x8xf32> to vector<2x8xf32>
    %43 = vector.shape_cast %42 : vector<2x8xf32> to vector<2x8x1xf32>
    %44 = tpu.reciprocal %43 {approx = true} : vector<2x8x1xf32> -> vector<2x8x1xf32>
    %45 = vector.broadcast %44 : vector<2x8x1xf32> to vector<2x8x8xf32>
    %46 = arith.mulf %41, %45 : vector<2x8x8xf32>
    %47 = arith.truncf %46 : vector<2x8x8xf32> to vector<2x8x8xbf16>
    "tpu.trace_start"() <{level = 10 : i32, message = "bqk,bkd->bqd"}> : () -> ()
    %cst_30 = arith.constant dense<0.000000e+00> : vector<2x8x128xf32>
    %48 = tpu.matmul %47, %26, %cst_30 {dimension_numbers = #tpu.dot_dimension_numbers<[2], [1], [1], [2], [0, 0, 0, 1, 1, 2], [0], [0]>} : vector<2x8x8xbf16>, vector<2x8x128xbf16>, vector<2x8x128xf32> -> vector<2x8x128xf32>
    "tpu.trace_stop"() : () -> ()
    %49 = vector.shape_cast %48 : vector<2x8x128xf32> to vector<16x128xf32>
    %50 = arith.truncf %49 : vector<16x128xf32> to vector<16x128xbf16>
    %c0_31 = arith.constant 0 : index
    %c0_32 = arith.constant 0 : index
    %51 = vector.load %arg12[%c0_31, %c0_32] : memref<128x128xbf16, #tpu.memory_space<vmem>>, vector<128x128xbf16>
    %cst_33 = arith.constant dense<0.000000e+00> : vector<16x128xf32>
    %52 = tpu.matmul %50, %51, %cst_33 {dimension_numbers = #tpu.dot_dimension_numbers<[1], [0], [0], [1], [0, 0, 1, 1], [], []>} : vector<16x128xbf16>, vector<128x128xbf16>, vector<16x128xf32> -> vector<16x128xf32>
    %c0_34 = arith.constant 0 : index
    %c0_35 = arith.constant 0 : index
    %53 = vector.load %arg13[%c0_34, %c0_35] : memref<1x128xf32, #tpu.memory_space<vmem>>, vector<1x128xf32>
    %54 = vector.broadcast %53 : vector<1x128xf32> to vector<16x128xf32>
    %55 = arith.addf %52, %54 : vector<16x128xf32>
    %56 = vector.shape_cast %55 : vector<16x128xf32> to vector<2x8x128xf32>
    %57 = arith.truncf %56 : vector<2x8x128xf32> to vector<2x8x128xbf16>
    %c0_36 = arith.constant 0 : index
    %c0_37 = arith.constant 0 : index
    %c0_38 = arith.constant 0 : index
    %58 = vector.load %arg14[%c0_36, %c0_37, %c0_38] : memref<2x8x128xbf16, #tpu.memory_space<vmem>>, vector<2x8x128xbf16>
    tpu.vector_store %arg14[%c0_36, %c0_37, %c0_38], %57 {strides = array<i32>} : memref<2x8x128xbf16, #tpu.memory_space<vmem>>, vector<2x8x128xbf16>,
    return
  }
  func.func @transform_0(%arg0: i32, %arg1: i32) -> (i32, i32, i32) {
    %c0_i32 = arith.constant 0 : i32
    %c0_i32_0 = arith.constant 0 : i32
    return %arg0, %arg1, %c0_i32 : i32, i32, i32
  }
  func.func @transform_1(%arg0: i32, %arg1: i32) -> (i32, i32, i32) {
    %c0_i32 = arith.constant 0 : i32
    %c0_i32_0 = arith.constant 0 : i32
    %c0_i32_1 = arith.constant 0 : i32
    return %arg0, %c0_i32, %c0_i32_0 : i32, i32, i32
  }
  func.func @transform_2(%arg0: i32, %arg1: i32) -> (i32, i32, i32) {
    %c0_i32 = arith.constant 0 : i32
    %c0_i32_0 = arith.constant 0 : i32
    %c0_i32_1 = arith.constant 0 : i32
    return %arg0, %c0_i32, %c0_i32_0 : i32, i32, i32
  }
  func.func @transform_3(%arg0: i32, %arg1: i32) -> (i32, i32, i32) {
    %c0_i32 = arith.constant 0 : i32
    %c0_i32_0 = arith.constant 0 : i32
    return %arg0, %arg1, %c0_i32 : i32, i32, i32
  }
  func.func @transform_4(%arg0: i32, %arg1: i32) -> (i32, i32) {
    %c0_i32 = arith.constant 0 : i32
    %c0_i32_0 = arith.constant 0 : i32
    %c0_i32_1 = arith.constant 0 : i32
    return %c0_i32, %c0_i32_0 : i32, i32
  }
  func.func @transform_5(%arg0: i32, %arg1: i32) -> (i32, i32) {
    %c0_i32 = arith.constant 0 : i32
    %c0_i32_0 = arith.constant 0 : i32
    %c0_i32_1 = arith.constant 0 : i32
    return %c0_i32, %c0_i32_0 : i32, i32
  }
  func.func @transform_6(%arg0: i32, %arg1: i32) -> (i32, i32) {
    %c0_i32 = arith.constant 0 : i32
    %c0_i32_0 = arith.constant 0 : i32
    %c0_i32_1 = arith.constant 0 : i32
    return %c0_i32, %c0_i32_0 : i32, i32
  }
  func.func @transform_7(%arg0: i32, %arg1: i32) -> (i32, i32) {
    %c0_i32 = arith.constant 0 : i32
    %c0_i32_0 = arith.constant 0 : i32
    %c0_i32_1 = arith.constant 0 : i32
    return %c0_i32, %c0_i32_0 : i32, i32
  }
  func.func @transform_8(%arg0: i32, %arg1: i32) -> (i32, i32) {
    %c0_i32 = arith.constant 0 : i32
    %c0_i32_0 = arith.constant 0 : i32
    %c0_i32_1 = arith.constant 0 : i32
    return %c0_i32, %c0_i32_0 : i32, i32
  }
  func.func @transform_9(%arg0: i32, %arg1: i32) -> (i32, i32) {
    %c0_i32 = arith.constant 0 : i32
    %c0_i32_0 = arith.constant 0 : i32
    %c0_i32_1 = arith.constant 0 : i32
    return %c0_i32, %c0_i32_0 : i32, i32
  }
  func.func @transform_10(%arg0: i32, %arg1: i32) -> (i32, i32) {
    %c0_i32 = arith.constant 0 : i32
    %c0_i32_0 = arith.constant 0 : i32
    %c0_i32_1 = arith.constant 0 : i32
    return %c0_i32, %c0_i32_0 : i32, i32
  }
  func.func @transform_11(%arg0: i32, %arg1: i32) -> (i32, i32) {
    %c0_i32 = arith.constant 0 : i32
    %c0_i32_0 = arith.constant 0 : i32
    %c0_i32_1 = arith.constant 0 : i32
    return %c0_i32, %c0_i32_0 : i32, i32
  }
  func.func @transform_12(%arg0: i32, %arg1: i32) -> (i32, i32, i32) {
    %c0_i32 = arith.constant 0 : i32
    %c0_i32_0 = arith.constant 0 : i32
    return %arg0, %arg1, %c0_i32 : i32, i32, i32
  }
}

</mosaic_0001>

<bundles_post_ra>
// kernel: self_attention.1
= control target key start
LH: loop header
LB: loop body
LE: loop exit
PB: predicated region body
PF: predicated region fallthrough
CT: control target
= control target key end

     0   :  { %17 = vsyncpa [#allocation3], 0  ;;  %s1028_s0 = inlined_call_operand.vmem [shape: bf16[2,8,128], index: 0, kind: input, shape index: {}]   ;;  %s1029_s1 = inlined_call_operand.vmem [shape: bf16[2,8,128], index: 1, kind: input, shape index: {}]   ;;  %s1030_s2 = inlined_call_operand.vmem [shape: bf16[2,8,128], index: 2, kind: input, shape index: {}]   ;;  %s1031_s3 = inlined_call_operand.vmem [shape: f32[2,8,1], index: 3, kind: input, shape index: {}]   ;;  %s1032_s4 = inlined_call_operand.vmem [shape: bf16[128,128], index: 4, kind: input, shape index: {}]   ;;  %s1033_s5 = inlined_call_operand.vmem [shape: f32[1,128], index: 5, kind: input, shape index: {}]   ;;  %s1034_s6 = inlined_call_operand.vmem [shape: bf16[128,128], index: 6, kind: input, shape index: {}]   ;;  %s1035_s7 = inlined_call_operand.vmem [shape: f32[1,128], index: 7, kind: input, shape index: {}]   ;;  %s1036_s8 = inlined_call_operand.hbm [shape: bf16[128,128], index: 8, kind: input, shape index: {}]   ;;  %s1037_s9 = inlined_call_operand.vmem [shape: f32[1,128], index: 9, kind: input, shape index: {}]   ;;  %s1038_s10 = inlined_call_operand.hbm [shape: bf16[128,128], index: 10, kind: input, shape index: {}]   ;;  %s1039_s11 = inlined_call_operand.vmem [shape: f32[1,128], index: 11, kind: input, shape index: {}]   ;;  %s1040_s12 = inlined_call_operand.hbm [shape: bf16[2,8,128], index: 12, kind: output, shape index: {}]  }
   0x1   :  { %18 = vsyncpa [#allocation6], 0 }
   0x2   :  { %19 = vsyncpa [#allocation4], 0  ;;  %s40_s23 = sshll.u32 %s1036_s8, 4  ;;  %s858_s24 = smov [#allocation2]   ;;  %s41_s23 = int_to_ptr.hbm [resolvable:$true] %s40_s23 }
   0x3   :  { %s42_s25 = sshll.u32 %s858_s24, 4  ;;  %s55_s28 = sshll.u32 %s1038_s10, 4  ;;  %s43_s25 = int_to_ptr.vmem [resolvable:$true] %s42_s25  ;;  %s56_s28 = int_to_ptr.hbm [resolvable:$true] %s55_s28 }
   0x4   :  { %s859_s29 = smov 64   ;;  %s860_s30 = smov 4  }
   0x5   :  { %48 = dma.hbm_to_vmem [thread:$0]  %s41_s23, 1024, %s43_s25, [#allocation3], %s859_s29, %s859_s29, %s860_s30  }
   0x6   :  { %s861_s13 = smov [#allocation5]  }
   0x7   :  { %s57_s14 = sshll.u32 %s861_s13, 4  ;;  %s58_s14 = int_to_ptr.vmem [resolvable:$true] %s57_s14 }
   0x8   :  { %63 = dma.hbm_to_vmem [thread:$0]  %s56_s28, 1024, %s58_s14, [#allocation6], %s859_s29, %s859_s29, %s860_s30  }
   0x9   :  { %852 = dma.done.wait [#allocation3], 1024  }
   0xa   :  { %853 = vsyncadd [#allocation3], 4294966272 }
   0xb   :  { %854 = dma.done.wait [#allocation6], 1024  }
   0xc   :  { %855 = vsyncadd [#allocation6], 4294966272  ;;  %v730_v0 = vld [vmem:[%s1032_s4 + $0x38] sm:$0xff]  ;;  %v729_v2 = vld [vmem:[%s1032_s4 + $0x30] sm:$0xff]  ;;  %v862_v19 = vmov 0   ;;  %vm407_vm0 = vcmask 64512  }
   0xd   :  { %v738_v1 = vld [vmem:[%s1034_s6 + $0x38] sm:$0xff]  ;;  %155 = vmatpush.bf16.msra.mxu0 %v730_v0  ;;  %v737_v3 = vld [vmem:[%s1034_s6 + $0x30] sm:$0xff]  ;;  %v728_v4 = vld [vmem:[%s1032_s4 + $0x28] sm:$0xff]  ;;  %766 = vset.pattern.permute.xlu0 %v862_v19  ;;  %vm435_vm1 = vcmask 1043456   ;;  %s863_s18 = smov [#allocation7]   ;;  %s564_s22 = sshll.u32 %s1040_s12, 4  ;;  %s565_s22 = int_to_ptr.hbm [resolvable:$true] %s564_s22 }
   0xe   :  { %243 = vmatpush.bf16.msra.mxu1 %v738_v1  ;;  %v736_v5 = vld [vmem:[%s1034_s6 + $0x28] sm:$0xff]  ;;  %v727_v6 = vld [vmem:[%s1032_s4 + $0x20] sm:$0xff]  ;;  %v726_v8 = vld [vmem:[%s1032_s4 + $0x18] sm:$0xff]  ;;  %767 = vset.pattern.permute.xlu1 %v862_v19  ;;  %s562_s19 = sshll.u32 %s863_s18, 4  ;;  %s563_s19 = int_to_ptr.vmem [resolvable:$true] %s562_s19 }
   0xf   :  { %v735_v7 = vld [vmem:[%s1034_s6 + $0x20] sm:$0xff]  ;;  %v734_v9 = vld [vmem:[%s1034_s6 + $0x18] sm:$0xff]  ;;  %v725_v10 = vld [vmem:[%s1032_s4 + $0x10] sm:$0xff] }
  0x10   :  { %v733_v11 = vld [vmem:[%s1034_s6 + $0x10] sm:$0xff]  ;;  %v724_v12 = vld [vmem:[%s1032_s4 + $0x8] sm:$0xff]  ;;  %v723_v14 = vld [vmem:[%s1032_s4] sm:$0xff] }
  0x11   :  { %156 = vmatpush.bf16.msra.mxu0 %v729_v2  ;;  %v732_v13 = vld [vmem:[%s1034_s6 + $0x8] sm:$0xff]  ;;  %v731_v15 = vld [vmem:[%s1034_s6] sm:$0xff]  ;;  %v746_v40 = vld [vmem:[#allocation2 + $0x38] sm:$0xff] }
  0x12   :  { %244 = vmatpush.bf16.msra.mxu1 %v737_v3  ;;  %v720_v16 = vld [vmem:[%s1028_s0] sm:$0xff]  ;;  %v378_v22 = vld [vmem:[%s1031_s3 + $0x8] sm:$0xff]  ;;  %331 = vmatpush.bf16.msra.mxu2 %v746_v40  ;;  %v745_v41 = vld [vmem:[#allocation2 + $0x30] sm:$0xff] }
  0x13   :  { %v721_v17 = vld [vmem:[%s1029_s1] sm:$0xff]  ;;  %386 = vperm.xlu1 %767, %v378_v22   ;;  %v392_v24 = vsub.f32 1.0, %v378_v22  ;;  %v744_v42 = vld [vmem:[#allocation2 + $0x28] sm:$0xff]  ;;  %v742_v49 = vld [vmem:[#allocation2 + $0x18] sm:$0xff] }
  0x14   :  { %v377_v18 = vld [vmem:[%s1031_s3] sm:$0xff]  ;;  %v741_v52 = vld [vmem:[#allocation2 + $0x10] sm:$0xff]  ;;  %v740_v53 = vld [vmem:[#allocation2 + $0x8] sm:$0xff] }
  0x15   :  { %157 = vmatpush.bf16.msra.mxu0 %v728_v4  ;;  %381 = vperm.xlu0 %766, %v377_v18   ;;  %v391_v20 = vsub.f32 1.0, %v377_v18  ;;  %v769_v23 = vld [vmem:[%s1035_s7] ss:$0 sm:$0xff]  ;;  %v394_v28 = vmul.f32 -1e+10, %v392_v24  ;;  %v753_v18 = vld [vmem:[#allocation5 + $0x30] sm:$0xff] }
  0x16   :  { %245 = vmatpush.bf16.msra.mxu1 %v736_v5  ;;  %v768_v25 = vld [vmem:[%s1033_s5] ss:$0 sm:$0xff]  ;;  %332 = vmatpush.bf16.msra.mxu2 %v745_v41 }
  0x17   :  { %v393_v21 = vmul.f32 -1e+10, %v391_v20  ;;  %v743_v46 = vld [vmem:[#allocation2 + $0x20] sm:$0xff]  ;;  %v752_v20 = vld [vmem:[#allocation5 + $0x28] sm:$0xff] }
  0x18   :  { %v739_v57 = vld [vmem:[#allocation2] sm:$0xff] }
  0x19   :  { %158 = vmatpush.bf16.msra.mxu0 %v727_v6  ;;  %v722_v60 = vld [vmem:[%s1030_s2] sm:$0xff] }
  0x1a   :  { %246 = vmatpush.bf16.msra.mxu1 %v735_v7  ;;  %333 = vmatpush.bf16.msra.mxu2 %v744_v42 }
  0x1b   :  { %402 = vperm.xlu1 %767, %v394_v28  }
  0x1d   :  { %159 = vmatpush.bf16.msra.mxu0 %v726_v8  ;;  %397 = vperm.xlu0 %766, %v393_v21   ;;  %v770_v8 = vld [vmem:[%s1037_s9] ss:$0 sm:$0xff] }
  0x1e   :  { %247 = vmatpush.bf16.msra.mxu1 %v734_v9  ;;  %334 = vmatpush.bf16.msra.mxu2 %v743_v46  ;;  %v751_v21 = vld [vmem:[#allocation5 + $0x20] sm:$0xff] }
  0x21   :  { %160 = vmatpush.bf16.msra.mxu0 %v725_v10 }
  0x22   :  { %248 = vmatpush.bf16.msra.mxu1 %v733_v11  ;;  %335 = vmatpush.bf16.msra.mxu2 %v742_v49 }
  0x25   :  { %161 = vmatpush.bf16.msra.mxu0 %v724_v12 }
  0x26   :  { %249 = vmatpush.bf16.msra.mxu1 %v732_v13  ;;  %336 = vmatpush.bf16.msra.mxu2 %v741_v52 }
  0x29   :  { %162 = vmatpush.bf16.msra.mxu0 %v723_v14 }
  0x2a   :  { %250 = vmatpush.bf16.msra.mxu1 %v731_v15  ;;  %337 = vmatpush.bf16.msra.mxu2 %v740_v53 }
  0x2c   :  { %163 = vmatmul.bf16.vlgmr.msra.gmra.mxu0 %v720_v16 }
  0x2d   :  { %251 = vmatmul.bf16.vlgmr.msra.gmra.mxu1 %v721_v17  ;;  %v754_v17 = vld [vmem:[#allocation5 + $0x38] sm:$0xff] }
  0x2e   :  { %338 = vmatpush.bf16.msra.mxu2 %v739_v57  ;;  %540 = vmatpush.bf16.msrb.mxu1 %v754_v17 }
  0x31   :  { %339 = vmatmul.bf16.vlgmr.msra.gmra.mxu2 %v722_v60 }
  0x32   :  { %541 = vmatpush.bf16.msrb.mxu1 %v753_v18 }
  0x36   :  { %542 = vmatpush.bf16.msrb.mxu1 %v752_v20 }
  0x3a   :  { %543 = vmatpush.bf16.msrb.mxu1 %v751_v21 }
  0x85   :  { %v387_v50 = vpop.permute.xlu1 %386 }
  0x87   :  { %v382_v39 = vpop.permute.xlu0 %381 }
  0x8d   :  { %v403_v56 = vpop.permute.xlu1 %402 }
  0x8f   :  { %v398_v44 = vpop.permute.xlu0 %397 }
  0xa9   :  { %v164_v29 = vpop.f32.mrf.mxu0 }
  0xaa   :  { %v252_v26 = vpop.f32.mrf.mxu1  ;;  %v165_v31 = vadd.f32 %v768_v25, %v164_v29 }
  0xab   :  { %v253_v27 = vadd.f32 %v769_v23, %v252_v26 }
  0xac   :  { %v345_v32 = vpack.c.bf16 %v165_v31, %v165_v31  ;;  %v748_v31 = vld [vmem:[#allocation5 + $0x8] sm:$0xff] }
  0xad   :  { %v347_v30 = vpack.c.bf16 %v253_v27, %v253_v27 }
  0xaf   :  { %358 = vmatpush.bf16.xpose.msra.mxu3 %v347_v30  ;;  %v749_v30 = vld [vmem:[#allocation5 + $0x10] sm:$0xff] }
  0xb1   :  { %v166_v36 = vpop.f32.mrf.mxu0 }
  0xb2   :  { %v254_v33 = vpop.f32.mrf.mxu1  ;;  %v167_v37 = vadd.f32 %v768_v25, %v166_v36  ;;  %v750_v25 = vld [vmem:[#allocation5 + $0x18] sm:$0xff] }
  0xb3   :  { %v255_v34 = vadd.f32 %v769_v23, %v254_v33  ;;  %544 = vmatpush.bf16.msrb.mxu1 %v750_v25 }
  0xb4   :  { %v346_v38 = vpack.c.bf16 %v167_v37, %v167_v37  ;;  %v340_v9 = vpop.f32.mrf.mxu2 }
  0xb5   :  { %v348_v35 = vpack.c.bf16 %v255_v34, %v255_v34  ;;  %v341_v10 = vadd.f32 %v770_v8, %v340_v9 }
  0xb6   :  { %359 = vmatmul.bf16.vlgmr.msra.gmra.mxu3 %v345_v32  ;;  %v747_v32 = vld [vmem:[#allocation5] sm:$0xff] }
  0xb7   :  { %371 = vmatpush.bf16.xpose.msrb.mxu3 %v348_v35  ;;  %v349_v11 = vpack.c.bf16 %v341_v10, %v341_v10  ;;  %545 = vmatpush.bf16.msrb.mxu1 %v749_v30 }
  0xb9   :  { %v437_v12 = vsel %vm435_vm1, %v349_v11, 0 }
  0xbb   :  { %546 = vmatpush.bf16.msrb.mxu1 %v748_v31 }
  0xbc   :  { %v342_v13 = vpop.f32.mrf.mxu2 }
  0xbd   :  { %v343_v14 = vadd.f32 %v770_v8, %v342_v13 }
  0xbf   :  { %446 = vmatpush.bf16.msra.mxu3 %v437_v12  ;;  %v350_v15 = vpack.c.bf16 %v343_v14, %v343_v14  ;;  %547 = vmatpush.bf16.msrb.mxu1 %v747_v32 }
  0xc1   :  { %v456_v16 = vsel %vm435_vm1, %v350_v15, 0 }
  0xc2   :  { %465 = vmatpush.bf16.msrb.mxu0 %v456_v16 }
  0xc6   :  { %372 = vmatmul.bf16.vlgmr.msrb.gmra.mxu3 %v346_v38 }
 0x139   :  { %v360_v43 = vpop.f32.mrf.mxu3 }
 0x13a   :  { %v389_v45 = vmul.f32 %v382_v39, %v360_v43  ;;  %v771_v39 = vld [vmem:[%s1039_s11] ss:$0 sm:$0xff] }
 0x13c   :  { %v405_v47 = vadd.f32 %v398_v44, %v389_v45 }
 0x13e   :  { %v408_v48 = vsel %vm407_vm0, %v405_v47, -inf }
 0x13f   :  { %409 = vmax.xlane.f32.xlu2 %v408_v48 }
 0x141   :  { %v362_v51 = vpop.f32.mrf.mxu3 }
 0x149   :  { %v373_v54 = vpop.f32.mrf.mxu3 }
 0x14a   :  { %v390_v55 = vmul.f32 %v387_v50, %v373_v54 }
 0x14c   :  { %v406_v58 = vadd.f32 %v403_v56, %v390_v55 }
 0x14e   :  { %v411_v59 = vsel %vm407_vm0, %v406_v58, -inf }
 0x14f   :  { %412 = vmax.xlane.f32.xlu2 %v411_v59 }
 0x151   :  { %v375_v61 = vpop.f32.mrf.mxu3 }
 0x1b2   :  { %v410_v62 = vpop.xlane.xlu2 %409 }
 0x1b3   :  { %v414_v63 = vsub.f32 %v405_v47, %v410_v62 }
 0x1b5   :  { %v416_v0 = vmul.f32 1.442695, %v414_v63 }
 0x1b7   :  { %772 = vpow2.f32 %v416_v0 }
 0x1bd   :  { %v773_v1 = vpop.eup %772 }
 0x1be   :  { %v420_v2 = vsel %vm407_vm0, %v773_v1, 0.0 }
 0x1bf   :  { %421 = vadd.xlane.f32.xlu0 %v420_v2 }
 0x1c2   :  { %v413_v3 = vpop.xlane.xlu2 %412 }
 0x1c3   :  { %v415_v4 = vsub.f32 %v406_v58, %v413_v3 }
 0x1c5   :  { %v418_v5 = vmul.f32 1.442695, %v415_v4 }
 0x1c7   :  { %774 = vpow2.f32 %v418_v5 }
 0x1cd   :  { %v775_v6 = vpop.eup %774 }
 0x1ce   :  { %v423_v7 = vsel %vm407_vm0, %v775_v6, 0.0 }
 0x1cf   :  { %424 = vadd.xlane.f32.xlu1 %v423_v7 }
 0x232   :  { %v422_v19 = vpop.xlane.xlu0 %421 }
 0x233   :  { %776 = vrcp.f32 %v422_v19 }
 0x239   :  { %v777_v22 = vpop.eup %776 }
 0x23a   :  { %v428_v23 = vmul.f32 %v777_v22, %v773_v1 }
 0x23c   :  { %v430_v24 = vpack.c.bf16 %v428_v23, %v428_v23 }
 0x23e   :  { %686 = vmatmul.msk.bf16.vlgmr.msra.gmra.mxu3 %vm407_vm0, %v430_v24 }
 0x242   :  { %v425_v26 = vpop.xlane.xlu1 %424 }
 0x243   :  { %778 = vrcp.f32 %v425_v26 }
 0x249   :  { %v779_v27 = vpop.eup %778 }
 0x24a   :  { %v429_v28 = vmul.f32 %v779_v27, %v775_v6 }
 0x24c   :  { %v431_v29 = vpack.c.bf16 %v429_v28, %v429_v28 }
 0x24e   :  { %687 = vmatmul.msk.bf16.vlgmr.msrb.gmra.mxu0 %vm407_vm0, %v431_v29 }
 0x2c1   :  { %v448_v33 = vpop.f32.mrf.mxu3 }
 0x2c9   :  { %v450_v34 = vpop.f32.mrf.mxu3 }
 0x2cb   :  { %v467_v35 = vpop.f32.mrf.mxu0 }
 0x2cc   :  { %v471_v36 = vpack.c.bf16 %v467_v35, %v448_v33 }
 0x2ce   :  { %548 = vmatmul.bf16.vlgmr.msrb.gmra.mxu1 %v471_v36 }
 0x2d3   :  { %v469_v37 = vpop.f32.mrf.mxu0 }
 0x34b   :  { %v549_v38 = vpop.f32.mrf.mxu1 }
 0x34c   :  { %v550_v41 = vadd.f32 %v771_v39, %v549_v38 }
 0x353   :  { %v551_v40 = vpop.f32.mrf.mxu1 }
 0x354   :  { %v552_v42 = vadd.f32 %v771_v39, %v551_v40 }
 0x356   :  { %v758_v43 = vpack.c.bf16 %v552_v42, %v550_v41 }
 0x358   :  { %759 = vst [vmem:[#allocation7] sm:$0xff] %v758_v43  }
 0x359   :  { %570 = dma.vmem_to_hbm [thread:$0]  %s563_s19, 128, %s565_s22, [#allocation4], %s859_s29, %s859_s29, %s860_s30  }
 0x35a   :  { %856 = dma.done.wait [#allocation4], 128  }
 0x35b   :  { %857 = vsyncadd [#allocation4], 4294967168 }
 0x35c   :  { %575 = vsyncpa [#allocation3], 1 }
 0x35d   :  { %576 = vsyncpa [#allocation6], 1 }
 0x35e   :  { %577 = vsyncpa [#allocation4], 1 }

</bundles_post_ra>
